<compile_context>
chip_gen: v7x
topology: tpu7x:2x2x1
jax: 0.10.0
libtpu: 0.0.40
codegen_flags: <defaults>
</compile_context>

<pallas_src>
import random

import numpy as np

import jax
import jax.numpy as jnp
from jax import lax
from jax.experimental import pallas as pl
from jax.experimental.pallas import tpu as pltpu


_MAX_VMEM_LIMIT = 64 * 1024 * 1024


def _cdiv(a: int, b: int) -> int:
    return -(-a // b)


def _round_up(a: int, m: int) -> int:
    return _cdiv(a, m) * m


def _vmem_config():
    """(vmem_limit_bytes, slab_budget_bytes) per chip generation.

    v5e/v6e have 128 MiB VMEM/core -> 64 MiB scoped limit; v7x has 64 MiB -> 32 MiB.
    """
    try:
        phys = int(pltpu.get_tpu_info().vmem_capacity_bytes)
    except Exception:  # pragma: no cover - fallback if the query is unavailable
        phys = 64 * 1024 * 1024
    limit = min(max(phys // 2, 16 * 1024 * 1024), _MAX_VMEM_LIMIT)
    slab = (limit * 3) // 4  # budget for operator + in/out pipeline buffers
    return limit, slab


def _fused_hw_threshold() -> int:
    """Max H*W for the Kronecker-fused path.

    The fused operator does ~hw/(h+w) times the separable FLOPs; v6e/v7x absorb
    that and stay ~mem-bound, v5e's much weaker MXU does not -> lower threshold.
    """
    try:
        kind = jax.devices()[0].device_kind.lower()
    except Exception:  # pragma: no cover
        kind = ""
    if "v5 lite" in kind or "v5e" in kind or "v5litepod" in kind:
        return 512
    return 1024


def _interp_matrix_np(out_size: int, in_size: int) -> np.ndarray:
    """Dense 1-D linear interpolation matrix, align_corners=True (host numpy).

    Row i holds the source weights for output position i, matching per-axis
    PyTorch F.interpolate(..., mode='bilinear', align_corners=True).
    """
    if out_size == 1:
        pos = np.zeros((1,), np.float64)
    else:
        pos = np.arange(out_size, dtype=np.float64) * ((in_size - 1) / (out_size - 1))
    i0 = np.clip(np.floor(pos).astype(np.int64), 0, in_size - 1)
    i1 = np.minimum(i0 + 1, in_size - 1)
    w1 = pos - i0
    w0 = 1.0 - w1
    m = np.zeros((out_size, in_size), np.float64)
    rows = np.arange(out_size)
    m[rows, i0] += w0
    m[rows, i1] += w1
    return m


def _choose_batch_tile(bc: int, row_bytes: int, op_bytes: int, slab_budget: int) -> int:
    """Batch tile whose (double-buffered) in+out slabs + operators fit VMEM,
    while exposing enough grid steps for pipelining and both v7x TensorCores."""
    avail = max(slab_budget - op_bytes, 4 * 8 * row_bytes)  # never below an 8-row tile
    cap = avail // (4 * row_bytes)  # 2 pipeline buffers x (in + out)
    cap = max(8, (cap // 8) * 8)
    cap = min(cap, 2048)
    # Aim for >= 8 grid steps (steady-state double-buffering; >= 4 per v7x core)
    # but keep tiles >= 64 rows so the ~0.35us/step overhead stays negligible.
    want = max(64, _round_up(_cdiv(bc, 8), 8))
    return int(min(cap, want, _round_up(bc, 8)))


# ---------------------------------------------------------------------------
# Kernels
# ---------------------------------------------------------------------------

def _fused_kernel(g_t_ref, x_ref, o_ref):
    """Small-image path: one lane-dense MXU matmul per block.

    g_t: (HW_pad, TN) slice of the fused down+up operator (right-multiply form).
    x  : (TB, HW_pad) slab of TB flattened images.
    """
    o_ref[...] = jnp.dot(
        x_ref[...].astype(g_t_ref.dtype),
        g_t_ref[...],
        preferred_element_type=jnp.float32,
    ).astype(o_ref.dtype)


def _separable_kernel(lhs_ref, rhs_ref, x_ref, o_ref):
    """Large-image path: per image, out = L @ img @ R with f32 accumulation.

    Blocks: L (hh, hh), R (ww, ww), x/o (TB, hh, ww).  TB images per grid step
    amortize the per-step grid/DMA overhead; each per-image matmul already has a
    full MXU M dimension (hh) in this regime, and the loop avoids any in-kernel
    transpose (the lane dim ww stays last throughout).
    """
    tb = x_ref.shape[0]

    def body(i, carry):
        xi = x_ref[i].astype(lhs_ref.dtype)
        t = jnp.dot(lhs_ref[...], xi, preferred_element_type=jnp.float32)
        t = t.astype(rhs_ref.dtype)
        o_ref[i] = jnp.dot(
            t, rhs_ref[...], preferred_element_type=jnp.float32
        ).astype(o_ref.dtype)
        return carry

    lax.fori_loop(0, tb, body, 0)


# ---------------------------------------------------------------------------
# Wrapper
# ---------------------------------------------------------------------------

def diff_scale(
    x: jax.Array, factor_min: float, seed: int = 0, force_separable: bool = False
) -> jax.Array:
    """Forward pass of DiffScale on a (B, C, H, W) array (NCHW, as in PyTorch).

    The scale factor is drawn uniformly from [factor_min, 1] with a host RNG,
    mirroring the PyTorch module's host-side `random.uniform`.
    """
    b, c, h, w = x.shape
    rng = random.Random(seed)
    factor = rng.uniform(factor_min, 1.0)
    h2 = max(int(h * factor), 1)
    w2 = max(int(w * factor), 1)

    dtype = x.dtype
    bc = b * c
    itemsize = jnp.dtype(dtype).itemsize
    # bf16 inputs -> bf16 operators (native MXU path, half the bytes); the
    # matmuls still accumulate in f32 via preferred_element_type.
    op_dtype = jnp.bfloat16 if dtype == jnp.bfloat16 else jnp.float32
    op_itemsize = jnp.dtype(op_dtype).itemsize

    vmem_limit, slab_budget = _vmem_config()

    # Host-side (numpy) construction of the factor-dependent operators: every
    # device shape stays factor-independent, so there are no per-seed compiles.
    a_dh = _interp_matrix_np(h2, h)  # (h2, h)
    a_dw = _interp_matrix_np(w2, w)  # (w2, w)
    a_uh = _interp_matrix_np(h, h2)  # (h, h2)
    a_uw = _interp_matrix_np(w, w2)  # (w, w2)
    m_h = a_uh @ a_dh  # (h, h)  float64
    m_w = a_uw @ a_dw  # (w, w)  float64

    use_fused = (h * w <= _fused_hw_threshold()) and not force_separable

    if use_fused:
        hw = h * w
        hw_pad = _round_up(hw, 128)  # lane-dense loads/stores (unmasked vst)
        # Kronecker-fused operator, right-multiply form:
        #   out_flat[b, p*W+q] = sum_{y,x} x_flat[b, y*W+x] * g_t[y*W+x, p*W+q]
        # with g_t[yW+x, pW+q] = m_h[p, y] * m_w[q, x]; zero-padded to hw_pad.
        g_np = np.einsum("py,qx->yxpq", m_h, m_w).reshape(hw, hw)
        g_pad = np.zeros((hw_pad, hw_pad), dtype=np.float32)
        g_pad[:hw, :hw] = g_np
        g_t = jnp.asarray(g_pad, dtype=op_dtype)

        row_bytes = hw_pad * itemsize
        op_bytes = hw_pad * hw_pad * op_itemsize * 2  # operator, double-buffered
        tb = _choose_batch_tile(bc, row_bytes, op_bytes, slab_budget)
        num_blocks = _cdiv(bc, tb)
        bc_pad = num_blocks * tb

        x2 = x.reshape(bc, hw)  # NCHW contiguous -> free reshape
        if bc_pad != bc or hw_pad != hw:
            x2 = jnp.pad(x2, ((0, bc_pad - bc), (0, hw_pad - hw)))

        # If the batch grid has only one step, split the N (g_t column) dim so
        # both v7x TensorCores get work; N/2 stays a multiple of 128.
        n_split = 2 if (num_blocks < 2 and hw_pad % 256 == 0) else 1
        tn = hw_pad // n_split

        cost = pl.CostEstimate(
            flops=int(2 * bc_pad * hw_pad * hw_pad),
            transcendentals=0,
            bytes_accessed=int(
                2 * bc_pad * hw_pad * itemsize + hw_pad * hw_pad * op_itemsize
            ),
        )

        out2 = pl.pallas_call(
            _fused_kernel,
            out_shape=jax.ShapeDtypeStruct((bc_pad, hw_pad), dtype),
            grid=(num_blocks, n_split),
            in_specs=[
                pl.BlockSpec((hw_pad, tn), lambda i, j: (0, j)),  # fused operator
                pl.BlockSpec((tb, hw_pad), lambda i, j: (i, 0)),  # image slab
            ],
            out_specs=pl.BlockSpec((tb, tn), lambda i, j: (i, j)),
            compiler_params=pltpu.CompilerParams(
                dimension_semantics=("parallel", "parallel"),
                vmem_limit_bytes=vmem_limit,
            ),
            cost_estimate=cost,
        )(g_t, x2)

        if bc_pad != bc or hw_pad != hw:
            out2 = out2[:bc, :hw]
        return out2.reshape(b, c, h, w)

    # ---- Separable path (large images), batched TB images per grid step ----
    # Lane-dense orientation: put the larger spatial dim last (lane dim) so the
    # stores are unmasked (guards shapes like 512x8); transpose back afterwards.
    transpose_imgs = h > w
    if transpose_imgs:
        hh, ww = w, h
        lhs_np, rhs_np = m_w, m_h.T  # out^T = M_w @ img^T @ M_h^T
        x3 = jnp.transpose(x, (0, 1, 3, 2)).reshape(bc, hh, ww)
    else:
        hh, ww = h, w
        lhs_np, rhs_np = m_h, m_w.T  # out = M_h @ img @ M_w^T
        x3 = x.reshape(bc, hh, ww)

    lhs_op = jnp.asarray(lhs_np.astype(np.float32), dtype=op_dtype)  # (hh, hh)
    rhs_op = jnp.asarray(rhs_np.astype(np.float32), dtype=op_dtype)  # (ww, ww)

    row_bytes = hh * ww * itemsize
    op_bytes = (hh * hh + ww * ww) * op_itemsize * 2  # operators, double-buffered
    tb = _choose_batch_tile(bc, row_bytes, op_bytes, slab_budget)
    num_blocks = _cdiv(bc, tb)
    bc_pad = num_blocks * tb
    if bc_pad != bc:
        x3 = jnp.pad(x3, ((0, bc_pad - bc), (0, 0), (0, 0)))

    cost = pl.CostEstimate(
        flops=int(2 * bc_pad * hh * ww * (hh + ww)),
        transcendentals=0,
        bytes_accessed=int(
            2 * bc_pad * hh * ww * itemsize + (hh * hh + ww * ww) * op_itemsize
        ),
    )

    out3 = pl.pallas_call(
        _separable_kernel,
        out_shape=jax.ShapeDtypeStruct((bc_pad, hh, ww), dtype),
        grid=(num_blocks,),
        in_specs=[
            pl.BlockSpec((hh, hh), lambda i: (0, 0)),        # left operator
            pl.BlockSpec((ww, ww), lambda i: (0, 0)),        # right operator
            pl.BlockSpec((tb, hh, ww), lambda i: (i, 0, 0)),  # TB images
        ],
        out_specs=pl.BlockSpec((tb, hh, ww), lambda i: (i, 0, 0)),
        compiler_params=pltpu.CompilerParams(
            dimension_semantics=("parallel",),
            vmem_limit_bytes=vmem_limit,
        ),
        cost_estimate=cost,
    )(lhs_op, rhs_op, x3)

    out3 = out3[:bc] if bc_pad != bc else out3
    out3 = out3.reshape(b, c, hh, ww)
    if transpose_imgs:
        out3 = jnp.transpose(out3, (0, 1, 3, 2))
    return out3


# ---------------------------------------------------------------------------
# Reference + tests
# ---------------------------------------------------------------------------

def _reference(x: jax.Array, factor_min: float, seed: int) -> np.ndarray:
    """Unfused two-resize linear-operator reference (host numpy, float64)."""
    b, c, h, w = x.shape
    rng = random.Random(seed)
    factor = rng.uniform(factor_min, 1.0)
    h2 = max(int(h * factor), 1)
    w2 = max(int(w * factor), 1)
    a_dh = _interp_matrix_np(h2, h)
    a_dw = _interp_matrix_np(w2, w)
    a_uh = _interp_matrix_np(h, h2)
    a_uw = _interp_matrix_np(w, w2)
    xf = np.asarray(x.astype(jnp.float32), dtype=np.float64).reshape(b * c, h, w)
    t = np.einsum("ph,bhw,qw->bpq", a_dh, xf, a_dw)
    ref = np.einsum("hp,bpq,wq->bhw", a_uh, t, a_uw)
    return ref.reshape(b, c, h, w)


if __name__ == "__main__":
    key = jax.random.PRNGKey(0)
    B, C, H, W = 2, 4, 16, 16
    x = jax.random.normal(key, (B, C, H, W), dtype=jnp.float32)
    ref = _reference(x, 0.5, 0)

    # 1) Fused (Kronecker) fast path, f32.
    y = jax.block_until_ready(diff_scale(x, factor_min=0.5, seed=0))
    assert y.shape == (B, C, H, W) and y.dtype == x.dtype
    assert float(np.max(np.abs(np.asarray(y, np.float64) - ref))) < 1e-3

    # 2) Batched separable path, forced at the same shape for verification.
    y_sep = jax.block_until_ready(
        diff_scale(x, factor_min=0.5, seed=0, force_separable=True)
    )
    assert float(np.max(np.abs(np.asarray(y_sep, np.float64) - ref))) < 1e-3

    # 3) Separable path with H > W exercises the lane-dense orientation swap.
    x_rect = jax.random.normal(jax.random.PRNGKey(1), (1, 2, 24, 16), dtype=jnp.float32)
    y_rect = jax.block_until_ready(
        diff_scale(x_rect, factor_min=0.5, seed=3, force_separable=True)
    )
    ref_rect = _reference(x_rect, 0.5, 3)
    assert y_rect.shape == x_rect.shape
    assert float(np.max(np.abs(np.asarray(y_rect, np.float64) - ref_rect))) < 1e-3

    # 4) bf16 input -> bf16 operators on the native MXU path, f32 accumulation.
    xb = x.astype(jnp.bfloat16)
    yb = jax.block_until_ready(diff_scale(xb, factor_min=0.5, seed=0))
    assert yb.dtype == jnp.bfloat16
    yb64 = np.asarray(yb.astype(jnp.float32), dtype=np.float64)
    assert float(np.max(np.abs(yb64 - ref))) < 1e-1

    print("KERNEL_OK")
</pallas_src>

<mosaic_0001>
module attributes {stable_mosaic.version = 11 : i64} {
  func.func @_fused_kernel(%arg0: i32, %arg1: i32, %arg2: memref<256x128xf32, #tpu.memory_space<vmem>>, %arg3: memref<8x256xf32, #tpu.memory_space<vmem>>, %arg4: memref<8x128xf32, #tpu.memory_space<vmem>>) attributes {dimension_semantics = [#tpu.dimension_semantics<parallel>, #tpu.dimension_semantics<parallel>], iteration_bounds = array<i64: 1, 2>, scalar_prefetch = 0 : i64, scratch_operands = 0 : i64, tpu.core_type = #tpu.core_type<tc>, window_params = [{transform_indices = @transform_0, window_bounds = array<i64: 256, 128>}, {transform_indices = @transform_1, window_bounds = array<i64: 8, 256>}, {transform_indices = @transform_2, window_bounds = array<i64: 8, 128>}]} {
    %c0 = arith.constant 0 : index
    %c0_0 = arith.constant 0 : index
    %0 = vector.load %arg3[%c0, %c0_0] : memref<8x256xf32, #tpu.memory_space<vmem>>, vector<8x256xf32>
    %c0_1 = arith.constant 0 : index
    %c0_2 = arith.constant 0 : index
    %1 = vector.load %arg2[%c0_1, %c0_2] : memref<256x128xf32, #tpu.memory_space<vmem>>, vector<256x128xf32>
    %cst = arith.constant dense<0.000000e+00> : vector<8x128xf32>
    %2 = tpu.matmul %0, %1, %cst {dimension_numbers = #tpu.dot_dimension_numbers<[1], [0], [0], [1], [0, 0, 1, 1], [], []>} : vector<8x256xf32>, vector<256x128xf32>, vector<8x128xf32> -> vector<8x128xf32>
    %c0_3 = arith.constant 0 : index
    %c0_4 = arith.constant 0 : index
    %3 = vector.load %arg4[%c0_3, %c0_4] : memref<8x128xf32, #tpu.memory_space<vmem>>, vector<8x128xf32>
    tpu.vector_store %arg4[%c0_3, %c0_4], %2 {strides = array<i32>} : memref<8x128xf32, #tpu.memory_space<vmem>>, vector<8x128xf32>,
    return
  }
  func.func @transform_0(%arg0: i32, %arg1: i32) -> (i32, i32) {
    %c0_i32 = arith.constant 0 : i32
    %c0_i32_0 = arith.constant 0 : i32
    return %c0_i32, %arg1 : i32, i32
  }
  func.func @transform_1(%arg0: i32, %arg1: i32) -> (i32, i32) {
    %c0_i32 = arith.constant 0 : i32
    %c0_i32_0 = arith.constant 0 : i32
    return %arg0, %c0_i32 : i32, i32
  }
  func.func @transform_2(%arg0: i32, %arg1: i32) -> (i32, i32) {
    %c0_i32 = arith.constant 0 : i32
    return %arg0, %arg1 : i32, i32
  }
}

</mosaic_0001>

<bundles_post_ra>
// kernel: tpu_custom_call.1
= control target key start
LH: loop header
LB: loop body
LE: loop exit
PB: predicated region body
PF: predicated region fallthrough
CT: control target
= control target key end

     0   :  { %7 = vsyncpa [#allocation3], 0  ;;  %s988_s0 = inlined_call_operand.hbm [shape: f32[256,256], index: 0, kind: input, shape index: {}]   ;;  %s989_s1 = inlined_call_operand.hbm [shape: f32[8,256], index: 1, kind: input, shape index: {}]   ;;  %s990_s2 = inlined_call_operand.hbm [shape: f32[8,256], index: 2, kind: output, shape index: {}]  }
   0x1   :  { %9 = vsyncpa [#allocation3 + $0x1], 0 }
   0x2   :  { %10 = vsyncpa [#allocation6], 0 }
   0x3   :  { %11 = vsyncpa [#allocation4], 0 }
   0x4   :  { %13 = vsyncpa [#allocation4 + $0x1], 0  ;;  %s734_s9 = smov 0   ;;  %s736_s10 = smov 0  }
   0x5   :  { %s738_s11 = smov 0   ;;  %s740_s12 = smov 0  }
   0x6   :  { %s742_s13 = smov 0   ;;  %s744_s14 = smov 0  }
   0x7 LB: > { %s409_s15 = sadd.s32 4294967295, %s711_s14   ;;  %s410_s16 = sadd.s32 4294967294, %s711_s14   ;;  %s711_s14 = sphi %s744_s14, %s19_s14   ;;  %s707_s13 = sphi %s742_s13, %s1018_s13   ;;  %s703_s12 = sphi %s740_s12, %s1017_s12   ;;  %s699_s11 = sphi %s738_s11, %s1016_s11   ;;  %s695_s10 = sphi %s736_s10, %s1015_s10   ;;  %s691_s9 = sphi %s734_s9, %s1014_s9  }
   0x8   : > { %s38_s17 = sadd.s32 1, %s699_s11  ;;  %p45_p0 = scmp.ne.s32.totalorder %s699_s11, %s695_s10 }
   0x9   : > { %p46_p1 = scmp.eq.s32.totalorder %s711_s14, 0  ;;  %p51_p2 = scmp.ne.s32.totalorder %s695_s10, %s691_s9 }
   0xa   : > { %p772_p3 = scmp.eq.s32.totalorder %s409_s15, 0  ;;  %p103_p4 = scmp.eq.s32.totalorder %s409_s15, 1 }
   0xb   : > { %p776_p5 = por %p46_p1, %p45_p0  ;;  %p109_p6 = scmp.eq.s32.totalorder %s410_s16, 1 }
   0xc   : > { %s997_s18 = scalar_select %p772_p3, 1, 0 }
   0xd   : > { %p782_p7 = por %p772_p3, %p51_p2  ;;  %p786_p8 = por %p103_p4, %p45_p0 }
   0xe   : > { %p790_p9 = por %p109_p6, %p51_p2  ;;  %p411_p10 = scmp.ge.s32.totalorder %s711_s14, 1 }
   0xf   : > { %s999_s20 = scalar_select %p782_p7, 1, 0 }
  0x10   : > { %s1000_s21 = scalar_select %p786_p8, 1, 0 }
  0x11   : > { %s1001_s22 = scalar_select %p790_p9, 1, 0 }
  0x12   : > { %p116_p11 = scmp.lt.s32.totalorder %s711_s14, 3  ;;  %s713_s24 = smov [#allocation5]  }
  0x13   : > { %s132_s25 = sshll.u32 %s713_s24, 4  ;;  %p512_p1 = scmp.lt.s32.totalorder %s711_s14, 2  ;;  %s133_s25 = int_to_ptr.vmem [resolvable:$true] %s132_s25 }
  0x14   : > { %p797_p13 = pnand %p411_p10, %p116_p11  ;;  %s28_s28 = sadd.s32 1, %s707_s13 }
  0x15   : > { %p806_p4 = pnand %p512_p1, %p776_p5  ;;  %p817_p6 = scmp.ge.s32.totalorder %s28_s28, 2 }
  0x16   : > { %s1002_s23 = scalar_select %p797_p13, 1, 0 }
  0x17   : > { %p499_p0 = pneg %p797_p13  ;;  %s143_s30 = sand.u32 1, %s699_s11  }
  0x18   : > { %s1003_s26 = scalar_select %p806_p4, 1, 0 }
  0x19   : > { %p812_p2 = pnand %p499_p0, %p772_p3  ;;  %s567_s5 = scalar_lea.hbm %s989_s1, 256 }
  0x1a   : > { %s1005_s29 = scalar_select %p817_p6, 1, 0 }
  0x1b   : > { %p568_p5 = scmp.ne.s32.totalorder %s989_s1, %s567_s5  ;;  %p569_p10 = pneg %p812_p2 }
  0x1c   : > { %p574_p0 = scmp.lt.u32.totalorder %s567_s5, %s989_s1 }
  0x1d   : > { %p570_p11 = pnand %p569_p10, %p568_p5 }
  0x1f   : > { %p571_p1 = pneg %p570_p11 }
  0x21   : > { %p576_p12 = pnand %p574_p0, %p571_p1 }
  0x23   : > { %579 = shalt.err (!%p576_p12)
}
  0x24   : > { %s580_s16 = scalar_lea.vmem %s133_s25, 256  ;;  %p588_p7 = scmp.lt.s32.totalorder %s133_s25, %s133_s25 }
  0x25   : > { %p581_p9 = scmp.ne.s32.totalorder %s133_s25, %s580_s16  ;;  %p589_p13 = scmp.lt.s32.totalorder %s580_s16, %s580_s16 }
  0x27   : > { %p583_p8 = pnand %p581_p9, %p569_p10  ;;  %p590_p4 = por %p589_p13, %p588_p7 }
  0x29   : > { %p584_p3 = pneg %p583_p8 }
  0x2b   : > { %p591_p6 = pnand %p590_p4, %p584_p3 }
  0x2d   : > { %594 = shalt.err (!%p591_p6)
}
  0x2e   : > { %502 = dma.hbm_to_vmem [thread:$0]  (!%p812_p2), %s989_s1, 256, %s133_s25, [#allocation6]  }
  0x2f   : > { %p1006_p9 = scmp.ne.s32.totalorder %s1005_s29, 0  ;;  %s414_s3 = sshll.u32 %s143_s30, 8 }
  0x30   : > { %s415_s5 = sshll.u32 %s707_s13, 7  ;;  %s147_s8 = scalar_lea.vmem [#allocation2], %s414_s3 }
  0x31   : > { %s1020_s28 = smov (%p1006_p9, %s28_s28), 0  ;;  %s848_s7 = scalar_lea.hbm %s988_s0, %s415_s5 }
  0x32   : > { %s35_s4 = ssub.s32 %s707_s13, %s1020_s28  ;;  %s153_s15 = sshll.u32 %s147_s8, 4  ;;  %s855_s15 = int_to_ptr.vmem [resolvable:$true] %s153_s15 }
  0x33   : > { %p36_p3 = scmp.eq.s32.totalorder %s35_s4, 0  ;;  %s857_s29 = scalar_lea.sflag [#allocation3], %s143_s30 }
  0x34   : > { %s595_s16 = scalar_lea.hbm %s848_s7, 4096  ;;  %p1007_p8 = scmp.ne.s32.totalorder %s1003_s26, 0 }
  0x35   : > { %s853_s25 = scalar_select %p36_p3, %s699_s11, %s38_s17  }
  0x36   : > { %p596_p7 = scmp.ne.s32.totalorder %s848_s7, %s595_s16  ;;  %p597_p12 = pneg %p1007_p8 }
  0x37   : > { %s600_s3 = scalar_lea.hbm %s988_s0, 8192  ;;  %p601_p2 = scmp.lt.u32.totalorder %s848_s7, %s988_s0 }
  0x38   : > { %p598_p13 = pnand %p597_p12, %p596_p7  ;;  %p602_p6 = scmp.lt.u32.totalorder %s600_s3, %s595_s16 }
  0x39   : > { %p604_p10 = scmp.lt.u32.totalorder %s595_s16, %s848_s7 }
  0x3a   : > { %p599_p4 = pneg %p598_p13  ;;  %p603_p5 = por %p602_p6, %p601_p2 }
  0x3c   : > { %p605_p11 = por %p604_p10, %p603_p5 }
  0x3e   : > { %p606_p1 = pnand %p605_p11, %p599_p4 }
  0x40   : > { %609 = shalt.err (!%p606_p1)
}
  0x41   : > { %s610_s17 = scalar_lea.vmem %s855_s15, 4096  ;;  %s714_s30 = smov [#allocation2]  }
  0x42   : > { %p611_p0 = scmp.ne.s32.totalorder %s855_s15, %s610_s17  ;;  %s615_s27 = sshll.u32 %s714_s30, 4  ;;  %s616_s27 = int_to_ptr.vmem [resolvable:$false] %s615_s27 }
  0x43   : > { %s617_s6 = scalar_lea.vmem %s616_s27, 8192  ;;  %p618_p7 = scmp.lt.s32.totalorder %s855_s15, %s616_s27 }
  0x44   : > { %p613_p9 = pnand %p611_p0, %p597_p12  ;;  %p619_p13 = scmp.lt.s32.totalorder %s617_s6, %s610_s17 }
  0x46   : > { %p614_p3 = pneg %p613_p9  ;;  %p620_p2 = por %p619_p13, %p618_p7 }
  0x48   : > { %p621_p6 = pnand %p620_p2, %p614_p3 }
  0x4a   : > { %624 = shalt.err (!%p621_p6)
}
  0x4b   : > { %s715_s8 = smov 256   ;;  %s716_s16 = smov 128  }
  0x4c   : > { %s717_s19 = smov 8   ;;  %p1008_p12 = scmp.ne.s32.totalorder %s1002_s23, 0 }
  0x4d   : > { %506 = dma.hbm_to_vmem [thread:$0]  (!%p1007_p8), %s848_s7, 4096, %s855_s15, %s857_s29, %s715_s8, %s716_s16, %s717_s19  }
  0x4e   : > { %165 = sbr.rel (%p1008_p12) target bundleno = 353 (0x161), region = 28  ;;  %s888_s24 = sand.u32 (!%p1008_p12), 1, %s695_s10  }
  0x4f   : > { %s417_s3 = sshll.u32 (!%p1008_p12), %s888_s24, 8  ;;  %s168_s4 = scalar_lea.sflag (!%p1008_p12), [#allocation3], %s888_s24 }
  0x50   : > { %s892_s5 = scalar_lea.vmem (!%p1008_p12), [#allocation2], %s417_s3  ;;  %p1009_p4 = scmp.ne.s32.totalorder (!%p1008_p12), %s999_s20, 0 }
  0x55   : > { %678 = dma.done.wait (%p1009_p4), %s168_s4, 4096  }
  0x56   : > { %680 = vsyncadd (%p1009_p4), %s168_s4, 4294963200  ;;  %p1010_p8 = scmp.ne.s32.totalorder %s997_s18, 0 }
  0x58   : > { %682 = dma.done.wait (%p1010_p8), [#allocation6], 256  }
  0x59   : > { %684 = vsyncadd (%p1010_p8), [#allocation6], 4294967040  ;;  %v214_v0 = vld [vmem:[%s892_s5 + $0x80] sm:$0xff]  ;;  %v215_v1 = vld [vmem:[%s892_s5 + $0x88] sm:$0xff]  ;;  %s419_s18 = sshll.u32 %s888_s24, 3  ;;  %s421_s20 = sshll.u32 %s703_s12, 7 }
  0x5a   : > { %v198_v2 = vld [vmem:[%s892_s5] sm:$0xff]  ;;  %v459_v3 = vpack.c.bf16 %v215_v1, %v214_v0  ;;  %v199_v4 = vld [vmem:[%s892_s5 + $0x8] sm:$0xff]  ;;  %v216_v5 = vld [vmem:[%s892_s5 + $0x90] sm:$0xff]  ;;  %s195_s23 = scalar_lea.vmem [#allocation7], %s419_s18  ;;  %s939_s29 = scalar_lea.hbm %s990_s2, %s421_s20 }
  0x5b   : > { %v217_v6 = vld [vmem:[%s892_s5 + $0x98] sm:$0xff]  ;;  %v461_v7 = vpack.c.bf16 %v199_v4, %v198_v2  ;;  %v200_v9 = vld [vmem:[%s892_s5 + $0x10] sm:$0xff]  ;;  %v218_v11 = vld [vmem:[%s892_s5 + $0xa0] sm:$0xff]  ;;  %s317_s26 = sshll.u32 %s195_s23, 4  ;;  %s302_s17 = scalar_lea.sflag [#allocation4], %s888_s24  ;;  %s941_s26 = int_to_ptr.vmem [resolvable:$true] %s317_s26 }
  0x5c   : > { %v463_v8 = vpack.c.bf16 %v217_v6, %v216_v5  ;;  %v201_v10 = vld [vmem:[%s892_s5 + $0x18] sm:$0xff]  ;;  %460 = vmatprep.subr.bf16.mxu0 %v459_v3  ;;  %v219_v12 = vld [vmem:[%s892_s5 + $0xa8] sm:$0xff]  ;;  %v202_v15 = vld [vmem:[%s892_s5 + $0x20] sm:$0xff]  ;;  %s625_s30 = scalar_lea.vmem %s941_s26, 128  ;;  %p1011_p10 = scmp.ne.s32.totalorder %s1000_s21, 0 }
  0x5d   : > { %462 = vmatpush3.bf16.msra.mxu0 %v461_v7  ;;  %v465_v13 = vpack.c.bf16 %v201_v10, %v200_v9  ;;  %v467_v14 = vpack.c.bf16 %v219_v12, %v218_v11  ;;  %v203_v16 = vld [vmem:[%s892_s5 + $0x28] sm:$0xff]  ;;  %v220_v17 = vld [vmem:[%s892_s5 + $0xb0] sm:$0xff]  ;;  %v221_v18 = vld [vmem:[%s892_s5 + $0xb8] sm:$0xff]  ;;  %p626_p5 = scmp.ne.s32.totalorder %s941_s26, %s625_s30  ;;  %s718_s12 = smov [#allocation7]  }
  0x5e   : > { %464 = vmatprep.subr.bf16.mxu0 %v463_v8  ;;  %v469_v19 = vpack.c.bf16 %v203_v16, %v202_v15  ;;  %v471_v20 = vpack.c.bf16 %v221_v18, %v220_v17  ;;  %v204_v21 = vld [vmem:[%s892_s5 + $0x30] sm:$0xff]  ;;  %v205_v22 = vld [vmem:[%s892_s5 + $0x38] sm:$0xff]  ;;  %v222_v23 = vld [vmem:[%s892_s5 + $0xc0] sm:$0xff]  ;;  %s629_s27 = sshll.u32 %s718_s12, 4  ;;  %s630_s27 = int_to_ptr.vmem [resolvable:$false] %s629_s27 }
  0x5f   : > { %v223_v24 = vld [vmem:[%s892_s5 + $0xc8] sm:$0xff]  ;;  %v473_v26 = vpack.c.bf16 %v205_v22, %v204_v21  ;;  %v206_v28 = vld [vmem:[%s892_s5 + $0x40] sm:$0xff]  ;;  %v224_v30 = vld [vmem:[%s892_s5 + $0xd0] sm:$0xff]  ;;  %p627_p11 = pnand %p626_p5, %p1011_p10  ;;  %s631_s6 = scalar_lea.vmem %s630_s27, 256 }
  0x60   : > { %v197_v25 = vld [vmem:[#allocation5 + $0x8] sm:$0xff]  ;;  %v475_v27 = vpack.c.bf16 %v223_v24, %v222_v23  ;;  %v225_v31 = vld [vmem:[%s892_s5 + $0xd8] sm:$0xff]  ;;  %v208_v34 = vld [vmem:[%s892_s5 + $0x50] sm:$0xff]  ;;  %p632_p0 = scmp.lt.s32.totalorder %s941_s26, %s630_s27  ;;  %p633_p9 = scmp.lt.s32.totalorder %s631_s6, %s625_s30 }
  0x61   : > { %466 = vmatpush3.bf16.msra.mxu0 %v465_v13  ;;  %294 = vmatprep.mubr.f32.mxu0 %v197_v25  ;;  %v207_v29 = vld [vmem:[%s892_s5 + $0x48] sm:$0xff]  ;;  %v479_v33 = vpack.c.bf16 %v225_v31, %v224_v30  ;;  %v209_v35 = vld [vmem:[%s892_s5 + $0x58] sm:$0xff]  ;;  %v226_v36 = vld [vmem:[%s892_s5 + $0xe0] sm:$0xff]  ;;  %p628_p1 = pneg %p627_p11 }
  0x62   : > { %468 = vmatprep.subr.bf16.mxu0 %v467_v14  ;;  %v477_v32 = vpack.c.bf16 %v207_v29, %v206_v28  ;;  %v227_v37 = vld [vmem:[%s892_s5 + $0xe8] sm:$0xff]  ;;  %v481_v38 = vpack.c.bf16 %v209_v35, %v208_v34  ;;  %v210_v40 = vld [vmem:[%s892_s5 + $0x60] sm:$0xff]  ;;  %v228_v42 = vld [vmem:[%s892_s5 + $0xf0] sm:$0xff]  ;;  %p634_p3 = por %p633_p9, %p632_p0 }
  0x63   : > { %v483_v39 = vpack.c.bf16 %v227_v37, %v226_v36  ;;  %v211_v41 = vld [vmem:[%s892_s5 + $0x68] sm:$0xff]  ;;  %v229_v43 = vld [vmem:[%s892_s5 + $0xf8] sm:$0xff]  ;;  %v212_v46 = vld [vmem:[%s892_s5 + $0x70] sm:$0xff] }
  0x64   : > { %v485_v44 = vpack.c.bf16 %v211_v41, %v210_v40  ;;  %v487_v45 = vpack.c.bf16 %v229_v43, %v228_v42  ;;  %v213_v47 = vld [vmem:[%s892_s5 + $0x78] sm:$0xff]  ;;  %v196_v49 = vld [vmem:[#allocation5] sm:$0xff]  ;;  %p635_p7 = pnand %p634_p3, %p628_p1 }
  0x65   : > { %470 = vmatpush3.bf16.msra.mxu0 %v469_v19  ;;  %v489_v48 = vpack.c.bf16 %v213_v47, %v212_v46 }
  0x66   : > { %472 = vmatprep.subr.bf16.mxu0 %v471_v20 }
  0x69   : > { %474 = vmatpush3.bf16.msra.mxu0 %v473_v26 }
  0x6a   : > { %476 = vmatprep.subr.bf16.mxu0 %v475_v27 }
  0x6d   : > { %478 = vmatpush3.bf16.msra.mxu0 %v477_v32 }
  0x6e   : > { %480 = vmatprep.subr.bf16.mxu0 %v479_v33 }
  0x71   : > { %482 = vmatpush3.bf16.msra.mxu0 %v481_v38 }
  0x72   : > { %484 = vmatprep.subr.bf16.mxu0 %v483_v39 }
  0x75   : > { %486 = vmatpush3.bf16.msra.mxu0 %v485_v44 }
  0x76   : > { %488 = vmatprep.subr.bf16.mxu0 %v487_v45 }
  0x79   : > { %490 = vmatpush3.bf16.msra.mxu0 %v489_v48 }
  0x7c   : > { %295 = vmatmul.mubr.f32.vlgmr.msra.gmra.mrb[0].mxu0 %v196_v49 }
 0x14f   : > { %v456_v50 = vpop.f32.mrb[0].mxu0 }
 0x150   : > { %v457_v51 = vpop.f32.mrb[1].mxu0 }
 0x151   : > { %v458_v52 = vadd.f32 %v457_v51, %v456_v50 }
 0x153   : > { %300 = vst [vmem:[%s195_s23] sm:$0xff] %v458_v52 }
 0x154   : > { %638 = shalt.err (!%p635_p7)
}
 0x155   : > { %s639_s8 = scalar_lea.hbm %s939_s29, 128  ;;  %s643_s24 = scalar_lea.hbm %s990_s2, 256 }
 0x156   : > { %p640_p13 = scmp.ne.s32.totalorder %s939_s29, %s639_s8  ;;  %p644_p12 = scmp.lt.u32.totalorder %s939_s29, %s990_s2 }
 0x157   : > { %p645_p4 = scmp.lt.u32.totalorder %s643_s24, %s639_s8  ;;  %p647_p5 = scmp.lt.u32.totalorder %s639_s8, %s939_s29 }
 0x158   : > { %p641_p2 = pnand %p640_p13, %p1011_p10 }
 0x159   : > { %p646_p8 = por %p645_p4, %p644_p12 }
 0x15a   : > { %p642_p6 = pneg %p641_p2 }
 0x15b   : > { %p648_p11 = por %p647_p5, %p646_p8 }
 0x15d   : > { %p649_p1 = pnand %p648_p11, %p642_p6 }
 0x15f   : > { %652 = shalt.err (!%p649_p1)
}
 0x160   : > { %497 = dma.vmem_to_hbm [thread:$0]  (%p1011_p10), %s941_s26, 128, %s939_s29, %s302_s17  }
 0x161 PF: > { %s329_s5 = sand.u32 1, %s691_s9   ;;  %p1012_p0 = scmp.ne.s32.totalorder %s1001_s22, 0 }
 0x162   : > { %p1013_p9 = scmp.ge.s32.totalorder %s711_s14, 2  ;;  %s330_s18 = scalar_lea.sflag [#allocation4], %s329_s5 }
 0x164   : > { %p508_p3 = pnand %p1013_p9, %p1012_p0 }
 0x166   : > { %686 = dma.done.wait (!%p508_p3), %s330_s18, 128  }
 0x167   : > { %688 = vsyncadd (!%p508_p3), %s330_s18, 4294967168  ;;  %s19_s14 = sadd.s32 1, %s711_s14   ;;  %s1014_s9 = smov %s695_s10 }
 0x168   : > { %p16_p7 = scmp.ge.s32.totalorder %s19_s14, 4   ;;  %s1015_s10 = smov %s699_s11 }
 0x169   : > { %s1016_s11 = smov %s853_s25  ;;  %s1017_s12 = smov %s707_s13 }
 0x16a   : > { %s1018_s13 = smov %s1020_s28  ;;  %18 = sbr.rel (!%p16_p7) target bundleno = 7 (0x7), region = 78 }
 0x171   :  { %335 = vsyncpa [#allocation3], 1 }
 0x172   :  { %337 = vsyncpa [#allocation3 + $0x1], 1 }
 0x173   :  { %338 = vsyncpa [#allocation6], 1 }
 0x174   :  { %339 = vsyncpa [#allocation4], 1 }
 0x175   :  { %341 = vsyncpa [#allocation4 + $0x1], 1 }

</bundles_post_ra>
